<compile_context>
chip_gen: v7x
topology: tpu7x:2x2x1
jax: 0.10.0
libtpu: 0.0.40
codegen_flags: <defaults>
</compile_context>

<pallas_src>
import functools

import numpy as np
import jax
import jax.numpy as jnp
from jax.experimental import pallas as pl
from jax.experimental.pallas import tpu as pltpu


# Nonzero taps of the 3x3 PixelCNN type-'B' mask: rows dy=0 fully, row dy=1 up
# to and including the center.  (dy=2 row and (1,2) are zeroed by the mask.)
_B_TAPS = ((0, 0, "L"), (0, 1, None), (0, 2, "R"), (1, 0, "L"), (1, 1, None))


# ------------------------------ Pallas kernel ------------------------------ #

def _fused_block_kernel(x_ref, cond_ref, wh_ref, bh_ref, w0_ref, b0_ref,
                        w1_ref, b1_ref, w2_ref, b2_ref, emask_ref, o_ref,
                        *, H, W):
    """Whole residual block for one batch image, channel-major (C, H*W).

    x_ref    : (1, Cin,  H*W)   input image (flattened spatial)
    cond_ref : (1, 1, 10)       class condition
    wh_ref   : (10, H*W)        h_func weight (transposed), bh_ref: (1, H*W)
    w0_ref   : (Cmid, Cin)      net0 1x1 conv weight,       b0_ref: (Cmid, 1)
    w1_ref   : (5, Cmid, Cmid)  masked 3x3 conv, nonzero taps only
    b1_ref   : (Cmid, 1)
    w2_ref   : (Cout, Cmid)     net2 1x1 conv weight,       b2_ref: (Cout, 1)
    emask_ref: (2, 1, H*W)      [0]=not-left-column, [1]=not-right-column
    o_ref    : (1, Cout, H*W)
    """
    HW = H * W
    f32 = jnp.float32

    x = x_ref[0]                                                    # (Cin, HW)

    # ---- net0: 1x1 conv + ReLU  ->  (Cmid, HW)
    h0 = jnp.dot(w0_ref[...], x, preferred_element_type=f32) + b0_ref[...]
    h0 = jnp.maximum(h0, 0.0)
    cmid = h0.shape[0]

    # ---- masked 3x3 conv (type 'B'), padding=1, only the 5 unmasked taps.
    # Left-pad W+1 zeros so every tap becomes a single static lane slice of
    # one shared buffer; horizontal borders are fixed by the edge masks.
    buf = jnp.concatenate([jnp.zeros((cmid, W + 1), f32), h0], axis=1)
    not_left = emask_ref[0]                                         # (1, HW)
    not_right = emask_ref[1]                                        # (1, HW)

    acc = jnp.zeros((cmid, HW), f32)
    for t, (dy, dx, edge) in enumerate(_B_TAPS):
        if (dy, dx) == (1, 1):
            s = h0                                   # center tap: no shift
        else:
            start = (W + 1) + (dy - 1) * W + (dx - 1)
            s = buf[:, start:start + HW]
        if edge == "L":
            s = s * not_left
        elif edge == "R":
            s = s * not_right
        acc = acc + jnp.dot(w1_ref[t], s, preferred_element_type=f32)
    acc = acc + b1_ref[...]

    # ---- conditional add: vh = h_func(cond), broadcast over channels.
    vh = jnp.dot(cond_ref[0], wh_ref[...],
                 preferred_element_type=f32) + bh_ref[...]          # (1, HW)
    acc = acc + vh

    # ---- relu0
    h1 = jnp.maximum(acc, 0.0)

    # ---- net2: 1x1 conv + ReLU
    h2 = jnp.dot(w2_ref[...], h1, preferred_element_type=f32) + b2_ref[...]
    h2 = jnp.maximum(h2, 0.0)

    # ---- residual
    o_ref[0] = (x + h2).astype(o_ref.dtype)


# -------------------------------- Wrapper ---------------------------------- #

@jax.jit
def residual_conditional_masked_conv(x, cond, params):
    """x: (B, C, H, W) f32 (NCHW);  cond: (B, 10) f32."""
    B, Cin, H, W = x.shape
    HW = H * W
    Cmid = params["w0"].shape[0]
    Cout = params["w2"].shape[0]
    assert Cout == Cin, "residual add requires output_num_dim == input_num_dim"

    # Extract the 5 nonzero taps of the (already masked) 3x3 weight.
    w1_taps = jnp.stack(
        [params["w1_full"][:, :, dy, dx] for dy, dx, _ in _B_TAPS])  # (5,Cm,Cm)

    # Horizontal border masks for the flattened-spatial shifted taps.
    col = np.arange(HW) % W
    emask = jnp.asarray(
        np.stack([(col != 0), (col != W - 1)]).astype(np.float32)[:, None, :])

    x_flat = x.reshape(B, Cin, HW)
    cond3 = cond.reshape(B, 1, cond.shape[-1])
    b0 = params["b0"].reshape(Cmid, 1)
    b1 = params["b1"].reshape(Cmid, 1)
    b2 = params["b2"].reshape(Cout, 1)
    bh = params["bh"].reshape(1, HW)

    kern = functools.partial(_fused_block_kernel, H=H, W=W)

    out_flat = pl.pallas_call(
        kern,
        out_shape=jax.ShapeDtypeStruct((B, Cout, HW), x.dtype),
        grid_spec=pltpu.PrefetchScalarGridSpec(
            num_scalar_prefetch=0,
            grid=(B,),
            in_specs=[
                pl.BlockSpec((1, Cin, HW), lambda b: (b, 0, 0)),      # x
                pl.BlockSpec((1, 1, 10), lambda b: (b, 0, 0)),        # cond
                pl.BlockSpec((10, HW), lambda b: (0, 0)),             # wh
                pl.BlockSpec((1, HW), lambda b: (0, 0)),              # bh
                pl.BlockSpec((Cmid, Cin), lambda b: (0, 0)),          # w0
                pl.BlockSpec((Cmid, 1), lambda b: (0, 0)),            # b0
                pl.BlockSpec((5, Cmid, Cmid), lambda b: (0, 0, 0)),   # w1 taps
                pl.BlockSpec((Cmid, 1), lambda b: (0, 0)),            # b1
                pl.BlockSpec((Cout, Cmid), lambda b: (0, 0)),         # w2
                pl.BlockSpec((Cout, 1), lambda b: (0, 0)),            # b2
                pl.BlockSpec((2, 1, HW), lambda b: (0, 0, 0)),        # edge mask
            ],
            out_specs=pl.BlockSpec((1, Cout, HW), lambda b: (b, 0, 0)),
        ),
        compiler_params=pltpu.CompilerParams(
            dimension_semantics=("parallel",)),
    )(x_flat, cond3, params["wh"], bh, params["w0"], b0,
      w1_taps, b1, params["w2"], b2, emask)

    return out_flat.reshape(B, Cout, H, W)


# --------------------------------- Params ----------------------------------- #

def init_params(key, num_input_dim=16, num_output_dim=16, H=28, W=28):
    cmid = num_input_dim // 2
    ks = jax.random.split(key, 8)
    # PixelCNN type-'B' mask for a 3x3 kernel (center row keeps the center).
    mask = np.ones((3, 3), np.float32)
    mask[2:, :] = 0.0
    mask[1, 2:] = 0.0
    w1 = 0.1 * jax.random.normal(ks[2], (cmid, cmid, 3, 3), jnp.float32)
    return {
        # net0: Conv2d(C, C//2, 1) as (Cout, Cin)
        "w0": 0.1 * jax.random.normal(ks[0], (cmid, num_input_dim), jnp.float32),
        "b0": 0.1 * jax.random.normal(ks[1], (cmid,), jnp.float32),
        # conv0: masked 3x3 (OIHW), mask applied once == `weight.data *= mask`
        "w1_full": w1 * jnp.asarray(mask)[None, None, :, :],
        "b1": 0.1 * jax.random.normal(ks[3], (cmid,), jnp.float32),
        # h_func: Linear(10, H*W); stored already transposed as (10, H*W)
        "wh": 0.1 * jax.random.normal(ks[4], (10, H * W), jnp.float32),
        "bh": 0.1 * jax.random.normal(ks[5], (H * W,), jnp.float32),
        # net2: Conv2d(C//2, C, 1) as (Cout, Cin)
        "w2": 0.1 * jax.random.normal(ks[6], (num_output_dim, cmid), jnp.float32),
        "b2": 0.1 * jax.random.normal(ks[7], (num_output_dim,), jnp.float32),
    }


# -------------------------------- Reference --------------------------------- #

def reference_forward(x, cond, params):
    B, Cin, H, W = x.shape
    hp = jax.lax.Precision.HIGHEST
    h = jnp.einsum("oc,bchw->bohw", params["w0"], x, precision=hp)
    h = h + params["b0"][None, :, None, None]
    h = jnp.maximum(h, 0.0)
    y = jax.lax.conv_general_dilated(
        h, params["w1_full"], (1, 1), ((1, 1), (1, 1)),
        dimension_numbers=("NCHW", "OIHW", "NCHW"), precision=hp)
    y = y + params["b1"][None, :, None, None]
    vh = jnp.dot(cond, params["wh"], precision=hp) + params["bh"]
    y = y + vh.reshape(B, 1, H, W)
    y = jnp.maximum(y, 0.0)
    y = jnp.einsum("oc,bchw->bohw", params["w2"], y, precision=hp)
    y = y + params["b2"][None, :, None, None]
    y = jnp.maximum(y, 0.0)
    return x + y


# ---------------------------------- Main ------------------------------------ #

if __name__ == "__main__":
    key = jax.random.PRNGKey(0)
    kx, kc, kp = jax.random.split(key, 3)

    # Spatial must be 28x28: h_func maps the 10-d class condition to 28*28 and
    # the result is broadcast-added to the conv output.
    B, C, H, W = 2, 16, 28, 28
    x = jax.random.normal(kx, (B, C, H, W), jnp.float32)
    cond = jax.random.normal(kc, (B, 10), jnp.float32)
    params = init_params(kp, num_input_dim=C, num_output_dim=C, H=H, W=W)

    out = jax.block_until_ready(residual_conditional_masked_conv(x, cond, params))
    ref = jax.block_until_ready(reference_forward(x, cond, params))

    assert out.shape == (B, C, H, W), out.shape
    np.testing.assert_allclose(np.asarray(out), np.asarray(ref),
                               rtol=2e-3, atol=2e-3)
    print("KERNEL_OK")
</pallas_src>

<mosaic_0001>
module attributes {stable_mosaic.version = 11 : i64} {
  func.func @_fused_block_kernel(%arg0: i32, %arg1: memref<1x16x784xf32, #tpu.memory_space<vmem>>, %arg2: memref<1x1x10xf32, #tpu.memory_space<vmem>>, %arg3: memref<10x784xf32, #tpu.memory_space<vmem>>, %arg4: memref<1x784xf32, #tpu.memory_space<vmem>>, %arg5: memref<8x16xf32, #tpu.memory_space<vmem>>, %arg6: memref<8x1xf32, #tpu.memory_space<vmem>>, %arg7: memref<5x8x8xf32, #tpu.memory_space<vmem>>, %arg8: memref<8x1xf32, #tpu.memory_space<vmem>>, %arg9: memref<16x8xf32, #tpu.memory_space<vmem>>, %arg10: memref<16x1xf32, #tpu.memory_space<vmem>>, %arg11: memref<2x1x784xf32, #tpu.memory_space<vmem>>, %arg12: memref<1x16x784xf32, #tpu.memory_space<vmem>>) attributes {dimension_semantics = [#tpu.dimension_semantics<parallel>], iteration_bounds = array<i64: 2>, scalar_prefetch = 0 : i64, scratch_operands = 0 : i64, tpu.core_type = #tpu.core_type<tc>, window_params = [{transform_indices = @transform_0, window_bounds = array<i64: 1, 16, 784>}, {transform_indices = @transform_1, window_bounds = array<i64: 1, 1, 10>}, {pipeline_mode = #tpu.pipeline_mode<synchronous>, transform_indices = @transform_2, window_bounds = array<i64: 10, 784>}, {pipeline_mode = #tpu.pipeline_mode<synchronous>, transform_indices = @transform_3, window_bounds = array<i64: 1, 784>}, {pipeline_mode = #tpu.pipeline_mode<synchronous>, transform_indices = @transform_4, window_bounds = array<i64: 8, 16>}, {pipeline_mode = #tpu.pipeline_mode<synchronous>, transform_indices = @transform_5, window_bounds = array<i64: 8, 1>}, {pipeline_mode = #tpu.pipeline_mode<synchronous>, transform_indices = @transform_6, window_bounds = array<i64: 5, 8, 8>}, {pipeline_mode = #tpu.pipeline_mode<synchronous>, transform_indices = @transform_7, window_bounds = array<i64: 8, 1>}, {pipeline_mode = #tpu.pipeline_mode<synchronous>, transform_indices = @transform_8, window_bounds = array<i64: 16, 8>}, {pipeline_mode = #tpu.pipeline_mode<synchronous>, transform_indices = @transform_9, window_bounds = array<i64: 16, 1>}, {pipeline_mode = #tpu.pipeline_mode<synchronous>, transform_indices = @transform_10, window_bounds = array<i64: 2, 1, 784>}, {transform_indices = @transform_11, window_bounds = array<i64: 1, 16, 784>}]} {
    %c0 = arith.constant 0 : index
    %c0_0 = arith.constant 0 : index
    %c0_1 = arith.constant 0 : index
    %0 = vector.load %arg1[%c0, %c0_0, %c0_1] : memref<1x16x784xf32, #tpu.memory_space<vmem>>, vector<1x16x784xf32>
    %1 = vector.shape_cast %0 : vector<1x16x784xf32> to vector<16x784xf32>
    %c0_2 = arith.constant 0 : index
    %c0_3 = arith.constant 0 : index
    %2 = vector.load %arg5[%c0_2, %c0_3] : memref<8x16xf32, #tpu.memory_space<vmem>>, vector<8x16xf32>
    %cst = arith.constant dense<0.000000e+00> : vector<8x784xf32>
    %3 = tpu.matmul %2, %1, %cst {dimension_numbers = #tpu.dot_dimension_numbers<[1], [0], [0], [1], [0, 0, 1, 1], [], []>} : vector<8x16xf32>, vector<16x784xf32>, vector<8x784xf32> -> vector<8x784xf32>
    %c0_4 = arith.constant 0 : index
    %c0_5 = arith.constant 0 : index
    %4 = vector.load %arg6[%c0_4, %c0_5] : memref<8x1xf32, #tpu.memory_space<vmem>>, vector<8x1xf32>
    %5 = vector.broadcast %4 : vector<8x1xf32> to vector<8x784xf32>
    %6 = arith.addf %3, %5 : vector<8x784xf32>
    %cst_6 = arith.constant 0.000000e+00 : f32
    %7 = vector.broadcast %cst_6 : f32 to vector<8x784xf32>
    %8 = arith.maximumf %6, %7 : vector<8x784xf32>
    %cst_7 = arith.constant 0.000000e+00 : f32
    %9 = vector.broadcast %cst_7 : f32 to vector<8x29xf32>
    %10 = tpu.concatenate %9, %8 in 1 : vector<8x29xf32>, vector<8x784xf32> -> vector<8x813xf32>
    %c0_8 = arith.constant 0 : index
    %c0_9 = arith.constant 0 : index
    %c0_10 = arith.constant 0 : index
    %11 = vector.load %arg11[%c0_8, %c0_9, %c0_10] : memref<2x1x784xf32, #tpu.memory_space<vmem>>, vector<1x1x784xf32>
    %12 = vector.shape_cast %11 : vector<1x1x784xf32> to vector<1x784xf32>
    %c1 = arith.constant 1 : index
    %c0_11 = arith.constant 0 : index
    %c0_12 = arith.constant 0 : index
    %13 = vector.load %arg11[%c1, %c0_11, %c0_12] : memref<2x1x784xf32, #tpu.memory_space<vmem>>, vector<1x1x784xf32>
    %14 = vector.shape_cast %13 : vector<1x1x784xf32> to vector<1x784xf32>
    %cst_13 = arith.constant 0.000000e+00 : f32
    %15 = vector.broadcast %cst_13 : f32 to vector<8x784xf32>
    %16 = vector.extract_strided_slice %10 {offsets = [0, 0], sizes = [8, 784], strides = [1, 1]} : vector<8x813xf32> to vector<8x784xf32>
    %17 = vector.broadcast %12 : vector<1x784xf32> to vector<8x784xf32>
    %18 = arith.mulf %16, %17 : vector<8x784xf32>
    %c0_14 = arith.constant 0 : index
    %c0_15 = arith.constant 0 : index
    %c0_16 = arith.constant 0 : index
    %19 = vector.load %arg7[%c0_14, %c0_15, %c0_16] : memref<5x8x8xf32, #tpu.memory_space<vmem>>, vector<1x8x8xf32>
    %20 = vector.shape_cast %19 : vector<1x8x8xf32> to vector<8x8xf32>
    %cst_17 = arith.constant dense<0.000000e+00> : vector<8x784xf32>
    %21 = tpu.matmul %20, %18, %cst_17 {dimension_numbers = #tpu.dot_dimension_numbers<[1], [0], [0], [1], [0, 0, 1, 1], [], []>} : vector<8x8xf32>, vector<8x784xf32>, vector<8x784xf32> -> vector<8x784xf32>
    %22 = arith.addf %15, %21 : vector<8x784xf32>
    %23 = vector.extract_strided_slice %10 {offsets = [0, 1], sizes = [8, 784], strides = [1, 1]} : vector<8x813xf32> to vector<8x784xf32>
    %c1_18 = arith.constant 1 : index
    %c0_19 = arith.constant 0 : index
    %c0_20 = arith.constant 0 : index
    %24 = vector.load %arg7[%c1_18, %c0_19, %c0_20] : memref<5x8x8xf32, #tpu.memory_space<vmem>>, vector<1x8x8xf32>
    %25 = vector.shape_cast %24 : vector<1x8x8xf32> to vector<8x8xf32>
    %cst_21 = arith.constant dense<0.000000e+00> : vector<8x784xf32>
    %26 = tpu.matmul %25, %23, %cst_21 {dimension_numbers = #tpu.dot_dimension_numbers<[1], [0], [0], [1], [0, 0, 1, 1], [], []>} : vector<8x8xf32>, vector<8x784xf32>, vector<8x784xf32> -> vector<8x784xf32>
    %27 = arith.addf %22, %26 : vector<8x784xf32>
    %28 = vector.extract_strided_slice %10 {offsets = [0, 2], sizes = [8, 784], strides = [1, 1]} : vector<8x813xf32> to vector<8x784xf32>
    %29 = vector.broadcast %14 : vector<1x784xf32> to vector<8x784xf32>
    %30 = arith.mulf %28, %29 : vector<8x784xf32>
    %c2 = arith.constant 2 : index
    %c0_22 = arith.constant 0 : index
    %c0_23 = arith.constant 0 : index
    %31 = vector.load %arg7[%c2, %c0_22, %c0_23] : memref<5x8x8xf32, #tpu.memory_space<vmem>>, vector<1x8x8xf32>
    %32 = vector.shape_cast %31 : vector<1x8x8xf32> to vector<8x8xf32>
    %cst_24 = arith.constant dense<0.000000e+00> : vector<8x784xf32>
    %33 = tpu.matmul %32, %30, %cst_24 {dimension_numbers = #tpu.dot_dimension_numbers<[1], [0], [0], [1], [0, 0, 1, 1], [], []>} : vector<8x8xf32>, vector<8x784xf32>, vector<8x784xf32> -> vector<8x784xf32>
    %34 = arith.addf %27, %33 : vector<8x784xf32>
    %35 = vector.extract_strided_slice %10 {offsets = [0, 28], sizes = [8, 784], strides = [1, 1]} : vector<8x813xf32> to vector<8x784xf32>
    %36 = vector.broadcast %12 : vector<1x784xf32> to vector<8x784xf32>
    %37 = arith.mulf %35, %36 : vector<8x784xf32>
    %c3 = arith.constant 3 : index
    %c0_25 = arith.constant 0 : index
    %c0_26 = arith.constant 0 : index
    %38 = vector.load %arg7[%c3, %c0_25, %c0_26] : memref<5x8x8xf32, #tpu.memory_space<vmem>>, vector<1x8x8xf32>
    %39 = vector.shape_cast %38 : vector<1x8x8xf32> to vector<8x8xf32>
    %cst_27 = arith.constant dense<0.000000e+00> : vector<8x784xf32>
    %40 = tpu.matmul %39, %37, %cst_27 {dimension_numbers = #tpu.dot_dimension_numbers<[1], [0], [0], [1], [0, 0, 1, 1], [], []>} : vector<8x8xf32>, vector<8x784xf32>, vector<8x784xf32> -> vector<8x784xf32>
    %41 = arith.addf %34, %40 : vector<8x784xf32>
    %c4 = arith.constant 4 : index
    %c0_28 = arith.constant 0 : index
    %c0_29 = arith.constant 0 : index
    %42 = vector.load %arg7[%c4, %c0_28, %c0_29] : memref<5x8x8xf32, #tpu.memory_space<vmem>>, vector<1x8x8xf32>
    %43 = vector.shape_cast %42 : vector<1x8x8xf32> to vector<8x8xf32>
    %cst_30 = arith.constant dense<0.000000e+00> : vector<8x784xf32>
    %44 = tpu.matmul %43, %8, %cst_30 {dimension_numbers = #tpu.dot_dimension_numbers<[1], [0], [0], [1], [0, 0, 1, 1], [], []>} : vector<8x8xf32>, vector<8x784xf32>, vector<8x784xf32> -> vector<8x784xf32>
    %45 = arith.addf %41, %44 : vector<8x784xf32>
    %c0_31 = arith.constant 0 : index
    %c0_32 = arith.constant 0 : index
    %46 = vector.load %arg8[%c0_31, %c0_32] : memref<8x1xf32, #tpu.memory_space<vmem>>, vector<8x1xf32>
    %47 = vector.broadcast %46 : vector<8x1xf32> to vector<8x784xf32>
    %48 = arith.addf %45, %47 : vector<8x784xf32>
    %c0_33 = arith.constant 0 : index
    %c0_34 = arith.constant 0 : index
    %c0_35 = arith.constant 0 : index
    %49 = vector.load %arg2[%c0_33, %c0_34, %c0_35] : memref<1x1x10xf32, #tpu.memory_space<vmem>>, vector<1x1x10xf32>
    %50 = vector.shape_cast %49 : vector<1x1x10xf32> to vector<1x10xf32>
    %c0_36 = arith.constant 0 : index
    %c0_37 = arith.constant 0 : index
    %51 = vector.load %arg3[%c0_36, %c0_37] : memref<10x784xf32, #tpu.memory_space<vmem>>, vector<10x784xf32>
    %cst_38 = arith.constant dense<0.000000e+00> : vector<1x784xf32>
    %52 = tpu.matmul %50, %51, %cst_38 {dimension_numbers = #tpu.dot_dimension_numbers<[1], [0], [0], [1], [0, 0, 1, 1], [], []>} : vector<1x10xf32>, vector<10x784xf32>, vector<1x784xf32> -> vector<1x784xf32>
    %c0_39 = arith.constant 0 : index
    %c0_40 = arith.constant 0 : index
    %53 = vector.load %arg4[%c0_39, %c0_40] : memref<1x784xf32, #tpu.memory_space<vmem>>, vector<1x784xf32>
    %54 = arith.addf %52, %53 : vector<1x784xf32>
    %55 = vector.broadcast %54 : vector<1x784xf32> to vector<8x784xf32>
    %56 = arith.addf %48, %55 : vector<8x784xf32>
    %cst_41 = arith.constant 0.000000e+00 : f32
    %57 = vector.broadcast %cst_41 : f32 to vector<8x784xf32>
    %58 = arith.maximumf %56, %57 : vector<8x784xf32>
    %c0_42 = arith.constant 0 : index
    %c0_43 = arith.constant 0 : index
    %59 = vector.load %arg9[%c0_42, %c0_43] : memref<16x8xf32, #tpu.memory_space<vmem>>, vector<16x8xf32>
    %cst_44 = arith.constant dense<0.000000e+00> : vector<16x784xf32>
    %60 = tpu.matmul %59, %58, %cst_44 {dimension_numbers = #tpu.dot_dimension_numbers<[1], [0], [0], [1], [0, 0, 1, 1], [], []>} : vector<16x8xf32>, vector<8x784xf32>, vector<16x784xf32> -> vector<16x784xf32>
    %c0_45 = arith.constant 0 : index
    %c0_46 = arith.constant 0 : index
    %61 = vector.load %arg10[%c0_45, %c0_46] : memref<16x1xf32, #tpu.memory_space<vmem>>, vector<16x1xf32>
    %62 = vector.broadcast %61 : vector<16x1xf32> to vector<16x784xf32>
    %63 = arith.addf %60, %62 : vector<16x784xf32>
    %cst_47 = arith.constant 0.000000e+00 : f32
    %64 = vector.broadcast %cst_47 : f32 to vector<16x784xf32>
    %65 = arith.maximumf %63, %64 : vector<16x784xf32>
    %66 = arith.addf %1, %65 : vector<16x784xf32>
    %c0_48 = arith.constant 0 : index
    %c0_49 = arith.constant 0 : index
    %c0_50 = arith.constant 0 : index
    %67 = vector.load %arg12[%c0_48, %c0_49, %c0_50] : memref<1x16x784xf32, #tpu.memory_space<vmem>>, vector<1x16x784xf32>
    %68 = vector.shape_cast %67 : vector<1x16x784xf32> to vector<16x784xf32>
    %69 = vector.shape_cast %66 : vector<16x784xf32> to vector<1x16x784xf32>
    tpu.vector_store %arg12[%c0_48, %c0_49, %c0_50], %69 {strides = array<i32>} : memref<1x16x784xf32, #tpu.memory_space<vmem>>, vector<1x16x784xf32>,
    return
  }
  func.func @transform_0(%arg0: i32) -> (i32, i32, i32) {
    %c0_i32 = arith.constant 0 : i32
    %c0_i32_0 = arith.constant 0 : i32
    %c0_i32_1 = arith.constant 0 : i32
    return %arg0, %c0_i32, %c0_i32_0 : i32, i32, i32
  }
  func.func @transform_1(%arg0: i32) -> (i32, i32, i32) {
    %c0_i32 = arith.constant 0 : i32
    %c0_i32_0 = arith.constant 0 : i32
    %c0_i32_1 = arith.constant 0 : i32
    return %arg0, %c0_i32, %c0_i32_0 : i32, i32, i32
  }
  func.func @transform_2(%arg0: i32) -> (i32, i32) {
    %c0_i32 = arith.constant 0 : i32
    %c0_i32_0 = arith.constant 0 : i32
    %c0_i32_1 = arith.constant 0 : i32
    return %c0_i32, %c0_i32_0 : i32, i32
  }
  func.func @transform_3(%arg0: i32) -> (i32, i32) {
    %c0_i32 = arith.constant 0 : i32
    %c0_i32_0 = arith.constant 0 : i32
    %c0_i32_1 = arith.constant 0 : i32
    return %c0_i32, %c0_i32_0 : i32, i32
  }
  func.func @transform_4(%arg0: i32) -> (i32, i32) {
    %c0_i32 = arith.constant 0 : i32
    %c0_i32_0 = arith.constant 0 : i32
    %c0_i32_1 = arith.constant 0 : i32
    return %c0_i32, %c0_i32_0 : i32, i32
  }
  func.func @transform_5(%arg0: i32) -> (i32, i32) {
    %c0_i32 = arith.constant 0 : i32
    %c0_i32_0 = arith.constant 0 : i32
    %c0_i32_1 = arith.constant 0 : i32
    return %c0_i32, %c0_i32_0 : i32, i32
  }
  func.func @transform_6(%arg0: i32) -> (i32, i32, i32) {
    %c0_i32 = arith.constant 0 : i32
    %c0_i32_0 = arith.constant 0 : i32
    %c0_i32_1 = arith.constant 0 : i32
    %c0_i32_2 = arith.constant 0 : i32
    return %c0_i32, %c0_i32_0, %c0_i32_1 : i32, i32, i32
  }
  func.func @transform_7(%arg0: i32) -> (i32, i32) {
    %c0_i32 = arith.constant 0 : i32
    %c0_i32_0 = arith.constant 0 : i32
    %c0_i32_1 = arith.constant 0 : i32
    return %c0_i32, %c0_i32_0 : i32, i32
  }
  func.func @transform_8(%arg0: i32) -> (i32, i32) {
    %c0_i32 = arith.constant 0 : i32
    %c0_i32_0 = arith.constant 0 : i32
    %c0_i32_1 = arith.constant 0 : i32
    return %c0_i32, %c0_i32_0 : i32, i32
  }
  func.func @transform_9(%arg0: i32) -> (i32, i32) {
    %c0_i32 = arith.constant 0 : i32
    %c0_i32_0 = arith.constant 0 : i32
    %c0_i32_1 = arith.constant 0 : i32
    return %c0_i32, %c0_i32_0 : i32, i32
  }
  func.func @transform_10(%arg0: i32) -> (i32, i32, i32) {
    %c0_i32 = arith.constant 0 : i32
    %c0_i32_0 = arith.constant 0 : i32
    %c0_i32_1 = arith.constant 0 : i32
    %c0_i32_2 = arith.constant 0 : i32
    return %c0_i32, %c0_i32_0, %c0_i32_1 : i32, i32, i32
  }
  func.func @transform_11(%arg0: i32) -> (i32, i32, i32) {
    %c0_i32 = arith.constant 0 : i32
    %c0_i32_0 = arith.constant 0 : i32
    %c0_i32_1 = arith.constant 0 : i32
    return %arg0, %c0_i32, %c0_i32_0 : i32, i32, i32
  }
}

</mosaic_0001>

<bundles_post_ra>
// kernel: residual_conditional_masked_conv.1
= control target key start
LH: loop header
LB: loop body
LE: loop exit
PB: predicated region body
PF: predicated region fallthrough
CT: control target
= control target key end

     0   :  { %s3593_s17 = smov 0   ;;  %s4097_s0 = inlined_call_operand.vmem [shape: f32[2,16,784], index: 0, kind: input, shape index: {}]   ;;  %s4098_s1 = inlined_call_operand.vmem [shape: f32[2,1,10], index: 1, kind: input, shape index: {}]   ;;  %s4099_s2 = inlined_call_operand.vmem [shape: f32[10,784], index: 2, kind: input, shape index: {}]   ;;  %s4100_s3 = inlined_call_operand.vmem [shape: f32[1,784], index: 3, kind: input, shape index: {}]   ;;  %s4101_s4 = inlined_call_operand.vmem [shape: f32[8,16], index: 4, kind: input, shape index: {}]   ;;  %s4102_s5 = inlined_call_operand.vmem [shape: f32[8,1], index: 5, kind: input, shape index: {}]   ;;  %s4103_s6 = inlined_call_operand.vmem [shape: f32[5,8,8], index: 6, kind: input, shape index: {}]   ;;  %s4104_s7 = inlined_call_operand.vmem [shape: f32[8,1], index: 7, kind: input, shape index: {}]   ;;  %s4105_s8 = inlined_call_operand.vmem [shape: f32[16,8], index: 8, kind: input, shape index: {}]   ;;  %s4106_s9 = inlined_call_operand.vmem [shape: f32[16,1], index: 9, kind: input, shape index: {}]   ;;  %s4107_s10 = inlined_call_operand.vmem [shape: f32[2,1,784], index: 10, kind: input, shape index: {}]   ;;  %s4108_s11 = inlined_call_operand.vmem [shape: f32[2,16,784], index: 11, kind: output, shape index: {}]  }
   0x1 LB: > { %s3305_s18 = sadd.s32 4294967295, %s3520_s17   ;;  %p3309_p0 = scmp.ge.s32.totalorder %s3520_s17, 1  ;;  %s3520_s17 = sphi %s3593_s17, %s21_s17  }
   0x2   : > { %p345_p1 = scmp.lt.s32.totalorder %s3520_s17, 3 }
   0x4   : > { %p346_p2 = pnand %p3309_p0, %p345_p1 }
   0x5   : > { %p388_p3 = scmp.lt.s32.totalorder (!%p346_p2), %s3305_s18, 1  ;;  %v3522_v0 = vmov (!%p346_p2), 0.0   ;;  %v416_v1 = vld [vmem:[%s4102_s5] sm:$0xff] (!%p346_p2)  ;;  %v3523_v2 = vmov (!%p346_p2), 0   ;;  %vm422_vm0 = vcmask (!%p346_p2), 130048   ;;  %v3524_v25 = vmov (!%p346_p2), 0.0|0.0  }
   0x6   : > { %349 = sbr.rel (%p346_p2) target bundleno = 989 (0x3dd), region = 64  ;;  %490 = vmatprep.mubr.f32.mxu0 (!%p346_p2), %v3522_v0  ;;  %561 = vmatprep.mubr.f32.mxu1 (!%p346_p2), %v3522_v0  ;;  %v415_v19 = vld [vmem:[%s4101_s4] sm:$0xff] (!%p346_p2)  ;;  %vm3525_vm1 = vmmov (!%p346_p2), 0   ;;  %v756_v26 = vlaneseq (!%p346_p2)  ;;  %s3526_s29 = smov (!%p346_p2), 2   ;;  %vm737_vm2 = vcmask (!%p346_p2), 236544   ;;  %vm1446_vm3 = vcmask (!%p346_p2), 15360  }
   0x7   : > { %3506 = vset.pattern.permute.xlu0 (!%p346_p2), %v3523_v2  ;;  %3507 = vset.pattern.permute.xlu1 (!%p346_p2), %v3523_v2  ;;  %v3316_v30 = vld [vmem:[%s4107_s10 + $0x7] sm:$0x7f] (!%p346_p2)  ;;  %s3527_s30 = smov (!%p346_p2), 29   ;;  %s3528_s14 = smov (!%p346_p2), 28   ;;  %vm1811_vm4 = vcmask (!%p346_p2), 228352   ;;  %vm816_vm5 = vcmask (!%p346_p2), 1039360  }
   0x8   : > { %419 = vperm.xlu0 (!%p346_p2), %3506, %v416_v1   ;;  %v757_v27 = vshrl.u32 (!%p346_p2), %v756_v26, 7  ;;  %s3529_s15 = smov (!%p346_p2), 127   ;;  %s3530_s16 = smov (!%p346_p2), 126   ;;  %vm830_vm6 = vcmask (!%p346_p2), 64512   ;;  %vm1490_vm7 = vcmask (!%p346_p2), 1031168   ;;  %vm1855_vm8 = vcmask (!%p346_p2), 818176  }
   0x9   : > { %s3531_s19 = smov (!%p346_p2), 100   ;;  %vm2526_vm9 = vcmask (!%p346_p2), 1041408   ;;  %vm3532_vm10 = vmmov (!%p346_p2), 1   ;;  %vm2522_vm12 = vcmask (!%p346_p2), 80896  }
   0xa   : > { %v3667_v28 = vsub.s32 (!%p346_p2), 1, %v757_v27  ;;  %v3669_v29 = vsub.s32 (!%p346_p2), 0, %v757_v27  ;;  %v3700_v52 = vsub.s32 (!%p346_p2), 2, %v757_v27  ;;  %v3711_v57 = vsub.s32 (!%p346_p2), 4, %v757_v27  ;;  %vm3965_vm11 = vmpackc.low (!%p346_p2), %vm2526_vm9, %vm3532_vm10 }
   0xb   : > { %v3715_v58 = vsub.s32 (!%p346_p2), 3, %v757_v27  ;;  %v3720_v61 = vsub.s32 (!%p346_p2), 6, %v757_v27  ;;  %v3725_v63 = vsub.s32 (!%p346_p2), 5, %v757_v27 }
   0xc   : > { %v1411_v31 = vrot.slane (!%p346_p2), %v3316_v30, %v3667_v28  ;;  %v1407_v32 = vrot.slane (!%p346_p2), %v3316_v30, %v3669_v29  ;;  %v1415_v56 = vrot.slane (!%p346_p2), %v3316_v30, %v3700_v52  ;;  %v1423_v60 = vrot.slane (!%p346_p2), %v3316_v30, %v3711_v57 }
   0xd   : > { %s4112_s18 = smov (!%p388_p3, %s3305_s18), 1  ;;  %v1419_v62 = vrot.slane %v3316_v30, %v3715_v58  ;;  %v1431_v1 = vrot.slane %v3316_v30, %v3720_v61  ;;  %v1427_v2 = vrot.slane %v3316_v30, %v3725_v63 }
   0xe   : > { %s3486_s21 = smul.u32 112, %s4112_s18  ;;  %1434 = vrot.lane.b32.xlu1 %v1411_v31, %s3526_s29  ;;  %1432 = vrot.lane.b32.xlu0 %v1407_v32, %s3526_s29  ;;  %s395_s13 = scalar_lea.vmem %s4098_s1, %s4112_s18 }
  0x10   : > { %s3614_s24 = scalar_lea.vmem %s4097_s0, %s3486_s21 }
  0x11   : > { %v3617_v3 = vld [vmem:[%s3614_s24 + $0x8] sm:$0xff]  ;;  %v409_v4 = vld [vmem:[%s3614_s24 + $0x40] sm:$0xff]  ;;  %v3621_v5 = vld [vmem:[%s3614_s24 + $0x18] sm:$0xff] }
  0x12   : > { %v3425_v6 = vpack.c.bf16 %v409_v4, %v3617_v3  ;;  %v411_v7 = vld [vmem:[%s3614_s24 + $0x50] sm:$0xff]  ;;  %v3626_v8 = vld [vmem:[%s3614_s24] sm:$0xff]  ;;  %v3629_v9 = vld [vmem:[%s3614_s24 + $0x38] sm:$0xff] }
  0x13   : > { %v3429_v10 = vpack.c.bf16 %v411_v7, %v3621_v5  ;;  %v3427_v11 = vpack.c.bf16 %v3629_v9, %v3626_v8  ;;  %v3635_v12 = vld [vmem:[%s3614_s24 + $0x10] sm:$0xff]  ;;  %v3638_v13 = vld [vmem:[%s3614_s24 + $0x48] sm:$0xff]  ;;  %v413_v16 = vld [vmem:[%s3614_s24 + $0x60] sm:$0xff] }
  0x14   : > { %v406_v14 = vld [vmem:[%s3614_s24 + $0x28] sm:$0xff]  ;;  %3426 = vmatprep.subr.bf16.mxu0 %v3425_v6  ;;  %v3431_v15 = vpack.c.bf16 %v3638_v13, %v3635_v12  ;;  %v405_v17 = vld [vmem:[%s3614_s24 + $0x20] sm:$0xff]  ;;  %v412_v18 = vld [vmem:[%s3614_s24 + $0x58] sm:$0xff] }
  0x15   : > { %3430 = vmatprep.subr.bf16.mxu1 %v3429_v10  ;;  %3428 = vmatpush1.bf16.msra.mxu0 %v3427_v11  ;;  %v3433_v20 = vpack.c.bf16 %v413_v16, %v406_v14  ;;  %v3435_v21 = vpack.c.bf16 %v412_v18, %v405_v17  ;;  %v3650_v22 = vld [vmem:[%s3614_s24 + $0x30] sm:$0xff]  ;;  %v3653_v23 = vld [vmem:[%s3614_s24 + $0x68] sm:$0xff]  ;;  %v752_v4 = vld [vmem:[%s4107_s10] sm:$0x7f] }
  0x16   : > { %3432 = vmatpush1.bf16.msra.mxu1 %v3431_v15  ;;  %v3438_v24 = vpack.c.bf16 %v3653_v23, %v3650_v22  ;;  %v3736_v6 = vrot.slane %v752_v4, %v3667_v28  ;;  %v3740_v7 = vrot.slane %v752_v4, %v3669_v29  ;;  %v3744_v10 = vrot.slane %v752_v4, %v3715_v58 }
  0x17   : > { %3434 = vmatprep.subr.bf16.mxu0 %v3433_v20  ;;  %3437 = vmatprep.subr.bf16.mxu1 %v3524_v25  ;;  %v3748_v11 = vrot.slane %v752_v4, %v3700_v52  ;;  %v3752_v14 = vrot.slane %v752_v4, %v3725_v63  ;;  %v3756_v15 = vrot.slane %v752_v4, %v3711_v57 }
  0x18   : > { %3312 = vmatmul.mubr.msk.f32.vlgmr.msra.gmra.mrb[0].mxu0 %vm422_vm0, %v415_v19  ;;  %v3761_v16 = vrot.slane %v752_v4, %v3720_v61 }
  0x19   : > { %3313 = vmatmul.mubr.msk.f32.vlgmr.msra.gmra.mrb[0].mxu1 %vm422_vm0, %v415_v19  ;;  %3436 = vmatpush1.bf16.msra.mxu0 %v3435_v21 }
  0x1a   : > { %3439 = vmatpush3.bf16.msra.mxu1 %v3438_v24  ;;  %632 = vmatprep.mubr.f32.mxu0 %v3522_v0 }
  0x1b   : > { %3385 = vmatprep.mubr.msk.f32.mxu1 %vm3525_vm1, %v3522_v0 }
  0x1c   : > { %3314 = vmatmul.mubr.msk.f32.vlgmr.msra.gmra.mrb[2].mxu0 %vm422_vm0, %v415_v19 }
  0x1d   : > { %3386 = vmatmul.mubr.msk.f32.vlgmr.msra.gmra.mrb[2].mxu1 %vm422_vm0, %v415_v19  ;;  %898 = vmatprep.mubr.f32.mxu0 %v3522_v0 }
  0x1e   : > { %969 = vmatprep.mubr.f32.mxu1 %v3522_v0 }
  0x80   : > { %v1435_v18 = vpop.permute.xlu1 %1434 }
  0x87   : > { %v420_v33 = vpop.permute.xlu0 %419 }
  0x8b   : > { %v1433_v17 = vpop.permute.xlu0 %1432 }
  0xeb   : > { %v492_v34 = vpop.f32.mrb[0].mxu0 }
  0xec   : > { %v3678_v35 = vadd.f32 %v492_v34, %v420_v33  ;;  %v563_v36 = vpop.f32.mrb[0].mxu1  ;;  %v494_v37 = vpop.f32.mrb[1].mxu0  ;;  %v1447_v34 = vsel %vm1446_vm3, %v1433_v17, %v1435_v18 }
  0xed   : > { %v3680_v38 = vadd.f32 %v563_v36, %v420_v33  ;;  %v565_v39 = vpop.f32.mrb[1].mxu1  ;;  %v3686_v43 = vadd.f32 %v494_v37, %v420_v33 }
  0xee   : > { %v709_v40 = vmax.f32 %v3678_v35, 0.0  ;;  %v3683_v41 = vadd.f32 %v565_v39, %v420_v33  ;;  %v2473_v35 = vld [vmem:[%s4099_s2 + $0x10] sm:$0xff] }
  0xef   : > { %v711_v42 = vmax.f32 %v3680_v38, 0.0  ;;  %v634_v44 = vpop.f32.mrb[2].mxu0  ;;  %v710_v50 = vmax.f32 %v3686_v43, 0.0  ;;  %v3336_v43 = vld [vmem:[%s4103_s6 + $0x20] sm:$0xff]  ;;  %v2478_v38 = vld [vmem:[%s4099_s2 + $0x38] sm:$0x3] }
  0xf0   : > { %v705_v45 = vpop.f32.mrb[2].mxu1  ;;  %v636_v46 = vpop.f32.mrb[3].mxu0  ;;  %723 = vrot.lane.b32.xlu0 %v709_v40, %s3527_s30  ;;  %v712_v48 = vmax.f32 %v3683_v41, 0.0  ;;  %v3696_v51 = vadd.f32 %v634_v44, %v420_v33  ;;  %v2479_v41 = vld [vmem:[%s4099_s2 + $0x40] sm:$0x3] }
  0xf1   : > { %727 = vrot.lane.b32.xlu1 %v711_v42, %s3527_s30  ;;  %v3387_v47 = vpop.f32.mrb[3].mxu1  ;;  %v3693_v49 = vadd.f32 %v636_v46, %v420_v33  ;;  %v3706_v55 = vadd.f32 %v705_v45, %v420_v33 }
  0xf2   : > { %v713_v54 = vmax.f32 %v3696_v51, 0.0  ;;  %v2482_v51 = vld [vmem:[%s4099_s2 + $0x58] sm:$0x3] }
  0xf3   : > { %v714_v53 = vmax.f32 %v3693_v49, 0.0  ;;  %v715_v59 = vmax.f32 %v3706_v55, 0.0  ;;  %v2484_v55 = vld [vmem:[%s4099_s2 + $0x68] sm:$0x3] }
  0xf4   : > { %729 = vrot.lane.b32.xlu0 %v712_v48, %s3527_s30 }
  0xf5   : > { %725 = vrot.lane.b32.xlu1 %v710_v50, %s3527_s30 }
  0xf8   : > { %733 = vrot.lane.b32.xlu0 %v714_v53, %s3527_s30 }
  0xf9   : > { %731 = vrot.lane.b32.xlu1 %v713_v54, %s3527_s30 }
  0xfc   : > { %1436 = vrot.lane.b32.xlu0 %v1415_v56, %s3526_s29 }
  0xfd   : > { %735 = vrot.lane.b32.xlu1 %v715_v59, %s3527_s30 }
 0x100   : > { %1440 = vrot.lane.b32.xlu0 %v1423_v60, %s3526_s29 }
 0x101   : > { %1438 = vrot.lane.b32.xlu1 %v1419_v62, %s3526_s29 }
 0x104   : > { %1444 = vrot.lane.b32.xlu0 %v1431_v1, %s3526_s29 }
 0x105   : > { %1442 = vrot.lane.b32.xlu1 %v1427_v2, %s3526_s29 }
 0x108   : > { %1799 = vrot.lane.b32.xlu0 %v3736_v6, %s3528_s14 }
 0x109   : > { %1797 = vrot.lane.b32.xlu1 %v3740_v7, %s3528_s14 }
 0x10c   : > { %1803 = vrot.lane.b32.xlu0 %v3744_v10, %s3528_s14 }
 0x10d   : > { %1801 = vrot.lane.b32.xlu1 %v3748_v11, %s3528_s14 }
 0x110   : > { %1807 = vrot.lane.b32.xlu0 %v3752_v14, %s3528_s14 }
 0x111   : > { %1805 = vrot.lane.b32.xlu1 %v3756_v15, %s3528_s14 }
 0x115   : > { %1809 = vrot.lane.b32.xlu1 %v3761_v16, %s3528_s14 }
 0x162   : > { %v724_v19 = vpop.permute.xlu0 %723 }
 0x163   : > { %v728_v20 = vpop.permute.xlu1 %727  ;;  %v3765_v21 = vsel %vm737_vm2, 0.0, %v724_v19 }
 0x164   : > { %802 = vrot.lane.b32.xlu0 %v3765_v21, %s3529_s15  ;;  %v1460_v2 = vmul.f32 %v1433_v17, %v3765_v21 }
 0x166   : > { %v730_v24 = vpop.permute.xlu0 %729 }
 0x167   : > { %v726_v26 = vpop.permute.xlu1 %725  ;;  %v3780_v33 = vsel %vm737_vm2, %v728_v20, %v730_v24 }
 0x168   : > { %v3770_v27 = vsel %vm737_vm2, %v724_v19, %v726_v26  ;;  %v3773_v30 = vsel %vm737_vm2, %v726_v26, %v728_v20 }
 0x169   : > { %806 = vrot.lane.b32.xlu1 %v3773_v30, %s3529_s15  ;;  %804 = vrot.lane.b32.xlu0 %v3770_v27, %s3529_s15  ;;  %v1461_v44 = vmul.f32 %v1447_v34, %v3770_v27 }
 0x16a   : > { %v734_v31 = vpop.permute.xlu0 %733 }
 0x16b   : > { %v732_v32 = vpop.permute.xlu1 %731 }
 0x16c   : > { %v3791_v56 = vsel %vm737_vm2, %v732_v32, %v734_v31  ;;  %v3794_v60 = vsel %vm737_vm2, %v730_v24, %v732_v32 }
 0x16d   : > { %808 = vrot.lane.b32.xlu1 %v3780_v33, %s3529_s15 }
 0x16e   : > { %v1437_v36 = vpop.permute.xlu0 %1436 }
 0x16f   : > { %v736_v37 = vpop.permute.xlu1 %735  ;;  %v1448_v39 = vsel %vm1446_vm3, %v1435_v18, %v1437_v36 }
 0x170   : > { %v1462_v45 = vmul.f32 %v1448_v39, %v3773_v30  ;;  %v3802_v4 = vsel %vm737_vm2, %v734_v31, %v736_v37 }
 0x171   : > { %1478 = vrot.lane.b32.xlu1 %v1461_v44, %s3530_s16 }
 0x172   : > { %1480 = vrot.lane.b32.xlu0 %v1462_v45, %s3530_s16  ;;  %v1441_v46 = vpop.permute.xlu0 %1440 }
 0x173   : > { %v1439_v47 = vpop.permute.xlu1 %1438 }
 0x174   : > { %v1449_v18 = vsel %vm1446_vm3, %v1437_v36, %v1439_v47  ;;  %v1450_v36 = vsel %vm1446_vm3, %v1439_v47, %v1441_v46 }
 0x175   : > { %812 = vrot.lane.b32.xlu1 %v3791_v56, %s3529_s15  ;;  %v1463_v24 = vmul.f32 %v1449_v18, %v3780_v33  ;;  %v1464_v44 = vmul.f32 %v1450_v36, %v3794_v60  ;;  %v2875_v36 = vld [vmem:[%s4106_s9] sm:$0xff] }
 0x176   : > { %810 = vrot.lane.b32.xlu0 %v3794_v60, %s3529_s15  ;;  %v1445_v62 = vpop.permute.xlu0 %1444 }
 0x177   : > { %v1443_v1 = vpop.permute.xlu1 %1442 }
 0x178   : > { %v1451_v45 = vsel %vm1446_vm3, %v1441_v46, %v1443_v1  ;;  %v1452_v18 = vsel %vm1446_vm3, %v1443_v1, %v1445_v62 }
 0x179   : > { %1476 = vrot.lane.b32.xlu1 %v1460_v2, %s3530_s16  ;;  %v1466_v47 = vmul.f32 %v1452_v18, %v3802_v4 }
 0x17a   : > { %814 = vrot.lane.b32.xlu0 %v3802_v4, %s3529_s15  ;;  %v1800_v19 = vpop.permute.xlu0 %1799 }
 0x17b   : > { %v1798_v20 = vpop.permute.xlu1 %1797 }
 0x17c   : > { %v1812_v26 = vsel %vm1811_vm4, %v1798_v20, %v1800_v19  ;;  %v1825_v37 = vmul.f32 %v1798_v20, %v3765_v21 }
 0x17d   : > { %v1826_v31 = vmul.f32 %v1812_v26, %v3770_v27 }
 0x17e   : > { %1482 = vrot.lane.b32.xlu0 %v1463_v24, %s3530_s16  ;;  %v1804_v2 = vpop.permute.xlu0 %1803 }
 0x17f   : > { %v1802_v17 = vpop.permute.xlu1 %1801 }
 0x180   : > { %v1813_v32 = vsel %vm1811_vm4, %v1800_v19, %v1802_v17  ;;  %v1465_v19 = vmul.f32 %v1451_v45, %v3791_v56  ;;  %v1814_v26 = vsel %vm1811_vm4, %v1802_v17, %v1804_v2 }
 0x181   : > { %v1827_v34 = vmul.f32 %v1813_v32, %v3773_v30  ;;  %v1828_v62 = vmul.f32 %v1814_v26, %v3780_v33 }
 0x182   : > { %1843 = vrot.lane.b32.xlu0 %v1826_v31, %s3531_s19  ;;  %v1808_v31 = vpop.permute.xlu0 %1807 }
 0x183   : > { %1845 = vrot.lane.b32.xlu1 %v1827_v34, %s3531_s19  ;;  %v1806_v39 = vpop.permute.xlu1 %1805 }
 0x184   : > { %v1815_v24 = vsel %vm1811_vm4, %v1804_v2, %v1806_v39  ;;  %v1816_v32 = vsel %vm1811_vm4, %v1806_v39, %v1808_v31  ;;  %v2876_v39 = vld [vmem:[%s4106_s9 + $0x8] sm:$0xff] }
 0x185   : > { %v1829_v46 = vmul.f32 %v1815_v24, %v3794_v60  ;;  %v1830_v17 = vmul.f32 %v1816_v32, %v3791_v56 }
 0x186   : > { %1841 = vrot.lane.b32.xlu0 %v1825_v37, %s3531_s19  ;;  %v2457_v37 = vld [vmem:[%s4104_s7] sm:$0xff] }
 0x187   : > { %1484 = vrot.lane.b32.xlu1 %v1464_v44, %s3530_s16  ;;  %v1810_v20 = vpop.permute.xlu1 %1809 }
 0x188   : > { %v1817_v1 = vsel %vm1811_vm4, %v1808_v31, %v1810_v20 }
 0x189   : > { %v1831_v34 = vmul.f32 %v1817_v1, %v3802_v4 }
 0x18a   : > { %1486 = vrot.lane.b32.xlu0 %v1465_v19, %s3530_s16 }
 0x18b   : > { %1488 = vrot.lane.b32.xlu1 %v1466_v47, %s3530_s16  ;;  %v3317_v47 = vld [vmem:[%s4103_s6 + $0x8] sm:$0xff] }
 0x18e   : > { %1849 = vrot.lane.b32.xlu0 %v1829_v46, %s3531_s19 }
 0x18f   : > { %1847 = vrot.lane.b32.xlu1 %v1828_v62, %s3531_s19 }
 0x192   : > { %1853 = vrot.lane.b32.xlu0 %v1831_v34, %s3531_s19  ;;  %v794_v34 = vmul.f32 %v3744_v10, %v3780_v33  ;;  %v791_v10 = vmul.f32 %v3740_v7, %v3765_v21  ;;  %v797_v7 = vmul.f32 %v3761_v16, %v3802_v4 }
 0x193   : > { %1851 = vrot.lane.b32.xlu1 %v1830_v17, %s3531_s19 }
 0x196   : > { %2879 = vperm.xlu0 %3506, %v2875_v36  }
 0x197   : > { %2460 = vperm.xlu1 %3507, %v2457_v37   ;;  %v793_v37 = vmul.f32 %v3748_v11, %v3773_v30  ;;  %v798_v11 = vld [vmem:[%s4103_s6] sm:$0xff] }
 0x19b   : > { %2884 = vperm.xlu1 %3507, %v2876_v39   ;;  %v792_v39 = vmul.f32 %v3736_v6, %v3770_v27  ;;  %v795_v6 = vmul.f32 %v3756_v15, %v3794_v60 }
 0x1d6   : > { %v803_v44 = vpop.permute.xlu0 %802 }
 0x1db   : > { %v807_v45 = vpop.permute.xlu1 %806  ;;  %v805_v2 = vpop.permute.xlu0 %804 }
 0x1dc   : > { %v817_v18 = vsel %vm816_vm5, %v803_v44, %v805_v2  ;;  %v818_v19 = vsel %vm816_vm5, %v805_v2, %v807_v45 }
 0x1dd   : > { %834 = vmatprep.subr.mxu0 %v818_v19 }
 0x1de   : > { %835 = vmatpush1.msra.mxu0 %v817_v18 }
 0x1df   : > { %v809_v24 = vpop.permute.xlu1 %808  ;;  %3318 = vmatmul.mubr.msk.f32.vlgmr.msra.gmra.mrb[4].mxu0 %vm830_vm6, %v3317_v47 }
 0x1e0   : > { %1040 = vmatprep.mubr.f32.mxu0 %v3522_v0  ;;  %v819_v62 = vsel %vm816_vm5, %v807_v45, %v809_v24  ;;  %v796_v45 = vmul.f32 %v3752_v14, %v3791_v56  ;;  %v3326_v56 = vld [vmem:[%s4103_s6 + $0x10] sm:$0xff] }
 0x1e3   : > { %v1479_v20 = vpop.permute.xlu1 %1478 }
 0x1e4   : > { %v1481_v26 = vpop.permute.xlu0 %1480 }
 0x1e5   : > { %v1492_v27 = vsel %vm1490_vm7, %v1479_v20, %v1481_v26 }
 0x1e7   : > { %v813_v1 = vpop.permute.xlu1 %812 }
 0x1e8   : > { %v811_v31 = vpop.permute.xlu0 %810 }
 0x1e9   : > { %v820_v46 = vsel %vm816_vm5, %v809_v24, %v811_v31  ;;  %v821_v36 = vsel %vm816_vm5, %v811_v31, %v813_v1 }
 0x1ea   : > { %905 = vmatprep.subr.mxu1 %v820_v46 }
 0x1eb   : > { %906 = vmatpush1.msra.mxu1 %v819_v62  ;;  %v1477_v44 = vpop.permute.xlu1 %1476 }
 0x1ec   : > { %3319 = vmatmul.mubr.msk.f32.vlgmr.msra.gmra.mrb[4].mxu1 %vm830_vm6, %v3317_v47  ;;  %3388 = vmatprep.subr.mxu1 %v3522_v0  ;;  %v815_v32 = vpop.permute.xlu0 %814  ;;  %v1491_v15 = vsel %vm1490_vm7, %v1477_v44, %v1479_v20 }
 0x1ed   : > { %3389 = vmatpush3.msra.mxu1 %v815_v32  ;;  %v822_v17 = vsel %vm816_vm5, %v813_v1, %v815_v32  ;;  %3390 = vmatprep.mubr.msk.f32.mxu1 %vm3525_vm1, %v3522_v0  ;;  %v3331_v1 = vld [vmem:[%s4103_s6 + $0x18] sm:$0xff] }
 0x1ee   : > { %976 = vmatprep.subr.mxu0 %v822_v17  ;;  %1191 = vmatprep.subr.mxu1 %v794_v34 }
 0x1ef   : > { %977 = vmatpush1.msra.mxu0 %v821_v36 }
 0x1f0   : > { %3320 = vmatmul.mubr.msk.f32.vlgmr.msra.gmra.mrb[6].mxu0 %vm830_vm6, %v3317_v47  ;;  %3391 = vmatmul.mubr.msk.f32.vlgmr.msra.gmra.mrb[6].mxu1 %vm830_vm6, %v3317_v47  ;;  %v1483_v33 = vpop.permute.xlu0 %1482 }
 0x1f1   : > { %1120 = vmatprep.subr.mxu0 %v792_v39  ;;  %1192 = vmatpush1.msra.mxu1 %v793_v37  ;;  %v1493_v4 = vsel %vm1490_vm7, %v1481_v26, %v1483_v33  ;;  %v2472_v37 = vld [vmem:[%s4099_s2 + $0x8] sm:$0xff]  ;;  %v2481_v39 = vld [vmem:[%s4099_s2 + $0x50] sm:$0x3] }
 0x1f2   : > { %1121 = vmatpush1.msra.mxu0 %v791_v10  ;;  %1184 = vmatprep.mubr.f32.mxu0 %v3522_v0  ;;  %v2476_v10 = vld [vmem:[%s4099_s2 + $0x28] sm:$0xff] }
 0x1f3   : > { %1262 = vmatprep.subr.mxu0 %v796_v45  ;;  %1255 = vmatprep.mubr.f32.mxu1 %v3522_v0 }
 0x1f4   : > { %3393 = vmatprep.subr.mxu1 %v3522_v0  ;;  %3322 = vmatmul.mubr.msk.f32.vlgmr.msra.gmra.mrb[4].mxu0 %vm830_vm6, %v798_v11  ;;  %v1844_v14 = vpop.permute.xlu0 %1843 }
 0x1f5   : > { %v1846_v21 = vpop.permute.xlu1 %1845  ;;  %3323 = vmatmul.mubr.msk.f32.vlgmr.msra.gmra.mrb[4].mxu1 %vm830_vm6, %v798_v11  ;;  %1263 = vmatpush1.msra.mxu0 %v795_v6  ;;  %v2470_v6 = vld [vmem:[%s395_s13] sm:$0x1]  ;;  %s4062_s13 = scalar_lea.vmem %s4108_s11, %s3486_s21 }
 0x1f6   : > { %3394 = vmatpush3.msra.mxu1 %v797_v7  ;;  %1507 = vmatprep.subr.mxu0 %v1492_v27  ;;  %v1857_v20 = vsel %vm1855_vm8, %v1844_v14, %v1846_v21 }
 0x1f7   : > { %1326 = vmatprep.mubr.f32.mxu0 %v3522_v0  ;;  %3395 = vmatprep.mubr.msk.f32.mxu1 %vm3525_vm1, %v3522_v0 }
 0x1f8   : > { %3324 = vmatmul.mubr.msk.f32.vlgmr.msra.gmra.mrb[6].mxu0 %vm830_vm6, %v798_v11  ;;  %v1842_v16 = vpop.permute.xlu0 %1841 }
 0x1f9   : > { %v1485_v30 = vpop.permute.xlu1 %1484  ;;  %3396 = vmatmul.mubr.msk.f32.vlgmr.msra.gmra.mrb[8].mxu1 %vm830_vm6, %v798_v11  ;;  %1508 = vmatpush1.msra.mxu0 %v1491_v15  ;;  %v1856_v31 = vsel %vm1855_vm8, %v1842_v16, %v1844_v14  ;;  %v2475_v11 = vld [vmem:[%s4099_s2 + $0x20] sm:$0xff] }
 0x1fa   : > { %v1494_v60 = vsel %vm1490_vm7, %v1483_v33, %v1485_v30  ;;  %1571 = vmatprep.mubr.f32.mxu0 %v3522_v0  ;;  %1642 = vmatprep.mubr.f32.mxu1 %v3522_v0  ;;  %v2483_v33 = vld [vmem:[%s4099_s2 + $0x60] sm:$0x3]  ;;  %v3455_v7 = vpack.c.bf16 %v2482_v51, %v2475_v11 }
 0x1fb   : > { %1578 = vmatprep.subr.mxu1 %v1494_v60 }
 0x1fc   : > { %1579 = vmatpush1.msra.mxu1 %v1493_v4  ;;  %3327 = vmatmul.mubr.msk.f32.vlgmr.msra.gmra.mrb[4].mxu0 %vm830_vm6, %v3326_v56  ;;  %v1487_v2 = vpop.permute.xlu0 %1486 }
 0x1fd   : > { %v1489_v18 = vpop.permute.xlu1 %1488  ;;  %3328 = vmatmul.mubr.msk.f32.vlgmr.msra.gmra.mrb[4].mxu1 %vm830_vm6, %v3326_v56  ;;  %3398 = vmatprep.subr.mxu1 %v3522_v0  ;;  %v1495_v19 = vsel %vm1490_vm7, %v1485_v30, %v1487_v2 }
 0x1fe   : > { %3399 = vmatpush3.msra.mxu1 %v1489_v18  ;;  %v1496_v47 = vsel %vm1490_vm7, %v1487_v2, %v1489_v18  ;;  %1713 = vmatprep.mubr.f32.mxu0 %v3522_v0 }
 0x1ff   : > { %1649 = vmatprep.subr.mxu0 %v1496_v47  ;;  %3400 = vmatprep.mubr.msk.f32.mxu1 %vm3525_vm1, %v3522_v0 }
 0x200   : > { %1650 = vmatpush1.msra.mxu0 %v1495_v19  ;;  %v1850_v24 = vpop.permute.xlu0 %1849 }
 0x201   : > { %v1848_v26 = vpop.permute.xlu1 %1847  ;;  %3329 = vmatmul.mubr.msk.f32.vlgmr.msra.gmra.mrb[6].mxu0 %vm830_vm6, %v3326_v56  ;;  %3401 = vmatmul.mubr.msk.f32.vlgmr.msra.gmra.mrb[10].mxu1 %vm830_vm6, %v3326_v56 }
 0x202   : > { %v1858_v46 = vsel %vm1855_vm8, %v1846_v21, %v1848_v26  ;;  %1872 = vmatprep.subr.mxu0 %v1857_v20  ;;  %v1859_v62 = vsel %vm1855_vm8, %v1848_v26, %v1850_v24  ;;  %1936 = vmatprep.mubr.f32.mxu0 %v3522_v0  ;;  %v2485_v20 = vld [vmem:[%s4100_s3] sm:$0x7f] }
 0x203   : > { %1873 = vmatpush1.msra.mxu0 %v1856_v31  ;;  %1943 = vmatprep.subr.mxu1 %v1859_v62 }
 0x204   : > { %1944 = vmatpush1.msra.mxu1 %v1858_v46  ;;  %2007 = vmatprep.mubr.f32.mxu1 %v3522_v0  ;;  %v1854_v32 = vpop.permute.xlu0 %1853 }
 0x205   : > { %v1852_v34 = vpop.permute.xlu1 %1851  ;;  %3332 = vmatmul.mubr.msk.f32.vlgmr.msra.gmra.mrb[4].mxu0 %vm830_vm6, %v3331_v1  ;;  %3333 = vmatmul.mubr.msk.f32.vlgmr.msra.gmra.mrb[4].mxu1 %vm830_vm6, %v3331_v1 }
 0x206   : > { %v1860_v17 = vsel %vm1855_vm8, %v1850_v24, %v1852_v34  ;;  %3403 = vmatprep.subr.mxu1 %v3522_v0  ;;  %v1861_v36 = vsel %vm1855_vm8, %v1852_v34, %v1854_v32  ;;  %2078 = vmatprep.mubr.f32.mxu0 %v3522_v0  ;;  %v2490_v34 = vrot.slane %v2485_v20, %v3669_v29 }
 0x207   : > { %3404 = vmatpush3.msra.mxu1 %v1854_v32  ;;  %2014 = vmatprep.subr.mxu0 %v1861_v36  ;;  %v2494_v36 = vrot.slane %v2485_v20, %v3667_v28 }
 0x208   : > { %2238 = vmatprep.subr.mxu1 %v712_v48  ;;  %2015 = vmatpush1.msra.mxu0 %v1860_v17  ;;  %v2474_v48 = vld [vmem:[%s4099_s2 + $0x18] sm:$0xff]  ;;  %v2498_v17 = vrot.slane %v2485_v20, %v3700_v52 }
 0x209   : > { %3405 = vmatprep.mubr.msk.f32.mxu1 %vm3525_vm1, %v3522_v0  ;;  %3334 = vmatmul.mubr.msk.f32.vlgmr.msra.gmra.mrb[6].mxu0 %vm830_vm6, %v3331_v1  ;;  %v3446_v49 = vpack.c.bf16 %v2481_v39, %v2474_v48 }
 0x20a   : > { %3406 = vmatmul.mubr.msk.f32.vlgmr.msra.gmra.mrb[12].mxu1 %vm830_vm6, %v3331_v1  ;;  %2167 = vmatprep.subr.mxu0 %v710_v50  ;;  %v2471_v50 = vld [vmem:[%s4099_s2] sm:$0xff] }
 0x20b   : > { %2239 = vmatpush1.msra.mxu1 %v711_v42  ;;  %2168 = vmatpush1.msra.mxu0 %v709_v40  ;;  %v2480_v40 = vld [vmem:[%s4099_s2 + $0x48] sm:$0x3]  ;;  %v3440_v42 = vpack.c.bf16 %v2479_v41, %v2472_v37  ;;  %v3443_v44 = vpack.c.bf16 %v2478_v38, %v2471_v50  ;;  %v2502_v37 = vrot.slane %v2485_v20, %v3715_v58 }
 0x20c   : > { %2309 = vmatprep.subr.mxu0 %v714_v53  ;;  %2231 = vmatprep.mubr.f32.mxu0 %v3522_v0  ;;  %v3449_v45 = vpack.c.bf16 %v2480_v40, %v2473_v35  ;;  %v2506_v40 = vrot.slane %v2485_v20, %v3711_v57 }
 0x20d   : > { %2302 = vmatprep.mubr.f32.mxu1 %v3522_v0  ;;  %3408 = vmatprep.subr.mxu1 %v3522_v0 }
 0x20e   : > { %3337 = vmatmul.mubr.msk.f32.vlgmr.msra.gmra.mrb[4].mxu0 %vm830_vm6, %v3336_v43  ;;  %3338 = vmatmul.mubr.msk.f32.vlgmr.msra.gmra.mrb[4].mxu1 %vm830_vm6, %v3336_v43 }
 0x20f   : > { %2310 = vmatpush1.msra.mxu0 %v713_v54  ;;  %3409 = vmatpush3.msra.mxu1 %v715_v59  ;;  %v2477_v54 = vld [vmem:[%s4099_s2 + $0x30] sm:$0xff]  ;;  %v3452_v59 = vpack.c.bf16 %v2483_v33, %v2476_v10  ;;  %v2510_v10 = vrot.slane %v2485_v20, %v3725_v63 }
 0x210   : > { %2373 = vmatprep.mubr.f32.mxu0 %v3522_v0  ;;  %3410 = vmatprep.mubr.msk.f32.mxu1 %vm3525_vm1, %v3522_v0  ;;  %v3459_v14 = vpack.c.bf16 %v2484_v55, %v2477_v54 }
 0x211   : > { %3442 = vmatprep.subr.msk.bf16.mxu0 %vm3965_vm11, %v3440_v42  ;;  %3448 = vmatprep.subr.msk.bf16.mxu1 %vm3965_vm11, %v3446_v49  ;;  %v2514_v42 = vrot.slane %v2485_v20, %v3720_v61 }
 0x212   : > { %3339 = vmatmul.mubr.msk.f32.vlgmr.msra.gmra.mrb[6].mxu0 %vm830_vm6, %v3336_v43  ;;  %3411 = vmatmul.mubr.msk.f32.vlgmr.msra.gmra.mrb[14].mxu1 %vm830_vm6, %v3336_v43 }
 0x213   : > { %3445 = vmatpush1.bf16.msk.msra.mxu0 %vm3965_vm11, %v3443_v44  ;;  %3451 = vmatpush1.bf16.msk.msra.mxu1 %vm3965_vm11, %v3449_v45 }
 0x214   : > { %2612 = vmatprep.mubr.f32.mxu0 %v3522_v0  ;;  %2683 = vmatprep.mubr.f32.mxu1 %v3522_v0 }
 0x215   : > { %3454 = vmatprep.subr.msk.bf16.mxu0 %vm3965_vm11, %v3452_v59  ;;  %3458 = vmatprep.subr.bf16.mxu1 %v3524_v25 }
 0x216   : > { %3343 = vmatmul.mubr.msk.f32.vlgmr.msra.gmra.mrb[8].mxu0 %vm2522_vm12, %v2470_v6  ;;  %3346 = vmatmul.mubr.msk.f32.vlgmr.msra.gmra.mrb[16].mxu1 %vm2522_vm12, %v2470_v6  ;;  %v2461_v41 = vpop.permute.xlu1 %2460 }
 0x217   : > { %3457 = vmatpush1.bf16.msk.msra.mxu0 %vm3965_vm11, %v3455_v7  ;;  %3461 = vmatpush3.bf16.msk.msra.mxu1 %vm3965_vm11, %v3459_v14 }
 0x218   : > { %2754 = vmatprep.mubr.f32.mxu0 %v3522_v0  ;;  %3417 = vmatprep.mubr.msk.f32.mxu1 %vm3525_vm1, %v3522_v0 }
 0x21a   : > { %3349 = vmatmul.mubr.msk.f32.vlgmr.msra.gmra.mrb[10].mxu0 %vm2522_vm12, %v2470_v6  ;;  %3418 = vmatmul.mubr.msk.f32.vlgmr.msra.gmra.mrb[18].mxu1 %vm2522_vm12, %v2470_v6 }
 0x21b   : > { %2957 = vmatprep.mubr.f32.mxu0 %v3522_v0  ;;  %3034 = vmatprep.mubr.f32.mxu1 %v3522_v0 }
 0x2c3   : > { %v1113_v25 = vpop.f32.mrb[6].mxu1 }
 0x2c4   : > { %v3392_v21 = vpop.f32.mrb[7].mxu1 }
 0x2cc   : > { %v1399_v27 = vpop.f32.mrb[8].mxu1 }
 0x2cd   : > { %v1400_v15 = vadd.f32 %v1399_v27, %v1113_v25  ;;  %v3397_v16 = vpop.f32.mrb[9].mxu1 }
 0x2d4   : > { %v1786_v30 = vpop.f32.mrb[10].mxu1 }
 0x2d5   : > { %v1796_v56 = vadd.f32 %v1786_v30, %v1400_v15  ;;  %v3402_v60 = vpop.f32.mrb[11].mxu1 }
 0x2dd   : > { %v2151_v4 = vpop.f32.mrb[12].mxu1 }
 0x2de   : > { %v2161_v2 = vadd.f32 %v2151_v4, %v1796_v56  ;;  %v3407_v18 = vpop.f32.mrb[13].mxu1 }
 0x2e1   : > { %v2233_v19 = vpop.f32.mrb[4].mxu0  ;;  %v2304_v47 = vpop.f32.mrb[4].mxu1 }
 0x2e2   : > { %v2235_v24 = vpop.f32.mrb[5].mxu0  ;;  %v2306_v26 = vpop.f32.mrb[5].mxu1  ;;  %v2463_v52 = vadd.f32 %v2461_v41, %v2233_v19  ;;  %v2465_v33 = vadd.f32 %v2461_v41, %v2304_v47 }
 0x2e3   : > { %v2464_v44 = vadd.f32 %v2461_v41, %v2235_v24  ;;  %v2466_v45 = vadd.f32 %v2461_v41, %v2306_v26  ;;  %v2873_v24 = vld [vmem:[%s4105_s8] sm:$0xff] }
 0x2e5   : > { %v2375_v31 = vpop.f32.mrb[6].mxu0  ;;  %v2446_v46 = vpop.f32.mrb[14].mxu1 }
 0x2e6   : > { %v2456_v62 = vadd.f32 %v2446_v46, %v2161_v2  ;;  %v2377_v1 = vpop.f32.mrb[7].mxu0  ;;  %v3412_v32 = vpop.f32.mrb[15].mxu1  ;;  %v2467_v27 = vadd.f32 %v2461_v41, %v2375_v31 }
 0x2e7   : > { %v2468_v56 = vadd.f32 %v2461_v41, %v2377_v1  ;;  %v2880_v1 = vpop.permute.xlu0 %2879 }
 0x2e8   : > { %v2469_v15 = vadd.f32 %v2461_v41, %v2456_v62  ;;  %v2874_v62 = vld [vmem:[%s4105_s8 + $0x8] sm:$0xff] }
 0x2e9   : > { %v2614_v48 = vpop.f32.mrb[8].mxu0  ;;  %v2685_v39 = vpop.f32.mrb[16].mxu1 }
 0x2ea   : > { %v2615_v43 = vadd.f32 %v2614_v48, %v2490_v34  ;;  %v2686_v50 = vadd.f32 %v2685_v39, %v2498_v17  ;;  %v2616_v38 = vpop.f32.mrb[9].mxu0  ;;  %v2687_v35 = vpop.f32.mrb[17].mxu1 }
 0x2eb   : > { %v2617_v49 = vadd.f32 %v2616_v38, %v2494_v36  ;;  %v2688_v53 = vadd.f32 %v2687_v35, %v2502_v37 }
 0x2ec   : > { %v2834_v28 = vrot.slane %v2615_v43, %v3669_v29  ;;  %v2842_v58 = vrot.slane %v2686_v50, %v3669_v29  ;;  %v2885_v43 = vpop.permute.xlu1 %2884 }
 0x2ed   : > { %v2838_v11 = vrot.slane %v2617_v49, %v3669_v29  ;;  %v2846_v51 = vrot.slane %v2688_v53, %v3669_v29  ;;  %v2756_v54 = vpop.f32.mrb[10].mxu0  ;;  %v2827_v57 = vpop.f32.mrb[18].mxu1 }
 0x2ee   : > { %v2859_v55 = vadd.f32 %v2834_v28, %v2463_v52  ;;  %v2861_v61 = vadd.f32 %v2842_v58, %v2465_v33  ;;  %v2757_v59 = vadd.f32 %v2756_v54, %v2506_v40  ;;  %v2828_v6 = vadd.f32 %v2827_v57, %v2514_v42  ;;  %v2758_v7 = vpop.f32.mrb[11].mxu0  ;;  %v3419_v63 = vpop.f32.mrb[19].mxu1 }
 0x2ef   : > { %v2759_v14 = vadd.f32 %v2758_v7, %v2510_v10  ;;  %v2860_v25 = vadd.f32 %v2838_v11, %v2464_v44  ;;  %v2862_v21 = vadd.f32 %v2846_v51, %v2466_v45  ;;  %v3508_v63 = vld [vmem:[%s3614_s24 + $0x40] sm:$0xff] }
 0x2f0   : > { %v2850_v16 = vrot.slane %v2757_v59, %v3669_v29  ;;  %v2858_v30 = vrot.slane %v2828_v6, %v3669_v29  ;;  %v2866_v18 = vmax.f32 %v2859_v55, 0.0  ;;  %v2868_v19 = vmax.f32 %v2861_v61, 0.0 }
 0x2f1   : > { %v2854_v60 = vrot.slane %v2759_v14, %v3669_v29  ;;  %v2867_v4 = vmax.f32 %v2860_v25, 0.0  ;;  %v2869_v2 = vmax.f32 %v2862_v21, 0.0  ;;  %v3509_v25 = vld [vmem:[%s3614_s24 + $0x50] sm:$0xff] }
 0x2f2   : > { %v2863_v47 = vadd.f32 %v2850_v16, %v2467_v27  ;;  %v2865_v26 = vadd.f32 %v2858_v30, %v2469_v15 }
 0x2f3   : > { %2893 = vmatprep.subr.mxu0 %v2867_v4  ;;  %2970 = vmatprep.subr.mxu1 %v2869_v2  ;;  %v2864_v20 = vadd.f32 %v2854_v60, %v2468_v56  ;;  %v3510_v60 = vld [vmem:[%s3614_s24 + $0x20] sm:$0xff] }
 0x2f4   : > { %2894 = vmatpush1.msra.mxu0 %v2866_v18  ;;  %2971 = vmatpush1.msra.mxu1 %v2868_v19  ;;  %v2872_v31 = vmax.f32 %v2865_v26, 0.0  ;;  %v2870_v46 = vmax.f32 %v2863_v47, 0.0  ;;  %v3511_v47 = vld [vmem:[%s3614_s24 + $0x28] sm:$0xff] }
 0x2f5   : > { %3352 = vmatmul.mubr.msk.f32.vlgmr.msra.gmra.mrb[12].mxu0 %vm830_vm6, %v2873_v24  ;;  %3354 = vmatmul.mubr.msk.f32.vlgmr.msra.gmra.mrb[20].mxu1 %vm830_vm6, %v2873_v24  ;;  %v2871_v29 = vmax.f32 %v2864_v20, 0.0 }
 0x2f6   : > { %3420 = vmatprep.subr.mxu1 %v2872_v31  ;;  %2963 = vmatprep.mubr.f32.mxu0 %v3522_v0 }
 0x2f7   : > { %3047 = vmatprep.subr.mxu0 %v2871_v29  ;;  %3421 = vmatpush3.msra.mxu1 %v2872_v31 }
 0x2f8   : > { %3040 = vmatprep.mubr.f32.mxu1 %v3522_v0  ;;  %3048 = vmatpush1.msra.mxu0 %v2870_v46  ;;  %v3512_v46 = vld [vmem:[%s3614_s24 + $0x58] sm:$0xff] }
 0x2f9   : > { %3353 = vmatmul.mubr.msk.f32.gmra.mrb[14].mxu0 %vm830_vm6, %v2874_v62  ;;  %3355 = vmatmul.mubr.msk.f32.gmra.mrb[22].mxu1 %vm830_vm6, %v2874_v62 }
 0x2fa   : > { %3111 = vmatprep.mubr.f32.mxu0 %v3522_v0  ;;  %3422 = vmatprep.mubr.msk.f32.mxu1 %vm830_vm6, %v2873_v24 }
 0x2fd   : > { %3356 = vmatmul.mubr.msk.f32.vlgmr.msra.gmra.mrb[16].mxu0 %vm830_vm6, %v2873_v24  ;;  %3423 = vmatmul.mubr.msk.f32.vlgmr.msra.gmra.mrb[24].mxu1 %vm830_vm6, %v2874_v62 }
 0x2fe   : > { %3117 = vmatprep.mubr.f32.mxu0 %v3522_v0 }
 0x301   : > { %3357 = vmatmul.mubr.msk.f32.gmra.mrb[18].mxu0 %vm830_vm6, %v2874_v62 }
 0x3c8   : > { %v2959_v32 = vpop.f32.mrb[12].mxu0  ;;  %v3036_v34 = vpop.f32.mrb[20].mxu1 }
 0x3c9   : > { %v2960_v17 = vadd.f32 %v2959_v32, %v2880_v1  ;;  %v3037_v36 = vadd.f32 %v3036_v34, %v2880_v1  ;;  %v2961_v37 = vpop.f32.mrb[13].mxu0  ;;  %v3038_v41 = vpop.f32.mrb[21].mxu1 }
 0x3ca   : > { %v2962_v48 = vadd.f32 %v2961_v37, %v2880_v1  ;;  %v3039_v39 = vadd.f32 %v3038_v41, %v2880_v1 }
 0x3cb   : > { %v3199_v50 = vmax.f32 %v2960_v17, 0.0  ;;  %v3201_v38 = vmax.f32 %v3037_v36, 0.0 }
 0x3cc   : > { %v3200_v0 = vmax.f32 %v2962_v48, 0.0  ;;  %v3202_v35 = vmax.f32 %v3039_v39, 0.0  ;;  %v2965_v40 = vpop.f32.mrb[14].mxu0  ;;  %v3042_v42 = vpop.f32.mrb[22].mxu1 }
 0x3cd   : > { %v3213_v49 = vadd.f32 %v3199_v50, %v3626_v8  ;;  %v3215_v53 = vadd.f32 %v3201_v38, %v3635_v12  ;;  %v2966_v10 = vadd.f32 %v2965_v40, %v2885_v43  ;;  %v3043_v52 = vadd.f32 %v3042_v42, %v2885_v43  ;;  %v2967_v33 = vpop.f32.mrb[15].mxu0  ;;  %v3044_v28 = vpop.f32.mrb[23].mxu1 }
 0x3ce   : > { %v3214_v58 = vadd.f32 %v3200_v0, %v3617_v3  ;;  %v3216_v44 = vadd.f32 %v3202_v35, %v3621_v5  ;;  %v2968_v45 = vadd.f32 %v2967_v33, %v2885_v43  ;;  %v3045_v11 = vadd.f32 %v3044_v28, %v2885_v43 }
 0x3cf   : > { %3227 = vst [vmem:[%s4062_s13] sm:$0xff] %v3213_v49  ;;  %3229 = vst [vmem:[%s4062_s13 + $0x10] sm:$0xff] %v3215_v53  ;;  %v3206_v51 = vmax.f32 %v2966_v10, 0.0  ;;  %v3208_v54 = vmax.f32 %v3043_v52, 0.0 }
 0x3d0   : > { %3228 = vst [vmem:[%s4062_s13 + $0x8] sm:$0xff] %v3214_v58  ;;  %3230 = vst [vmem:[%s4062_s13 + $0x18] sm:$0xff] %v3216_v44  ;;  %v3207_v8 = vmax.f32 %v2968_v45, 0.0  ;;  %v3209_v12 = vmax.f32 %v3045_v11, 0.0  ;;  %v3113_v57 = vpop.f32.mrb[16].mxu0  ;;  %v3424_v55 = vpop.f32.mrb[24].mxu1 }
 0x3d1   : > { %v3220_v3 = vadd.f32 %v3206_v51, %v3629_v9  ;;  %v3222_v5 = vadd.f32 %v3208_v54, %v3638_v13  ;;  %v3114_v61 = vadd.f32 %v3113_v57, %v2880_v1  ;;  %v3196_v59 = vadd.f32 %v3424_v55, %v2885_v43  ;;  %v3115_v6 = vpop.f32.mrb[17].mxu0  ;;  %v3190_v7 = vpop.f32.mrb[25].mxu1 }
 0x3d2   : > { %v3221_v14 = vadd.f32 %v3508_v63, %v3207_v8  ;;  %v3223_v21 = vadd.f32 %v3509_v25, %v3209_v12  ;;  %v3116_v27 = vadd.f32 %v3115_v6, %v2880_v1  ;;  %v3191_v15 = vadd.f32 %v3190_v7, %v2880_v1 }
 0x3d3   : > { %3234 = vst [vmem:[%s4062_s13 + $0x38] sm:$0xff] %v3220_v3  ;;  %3236 = vst [vmem:[%s4062_s13 + $0x48] sm:$0xff] %v3222_v5  ;;  %v3203_v16 = vmax.f32 %v3114_v61, 0.0  ;;  %v3212_v9 = vmax.f32 %v3196_v59, 0.0 }
 0x3d4   : > { %3235 = vst [vmem:[%s4062_s13 + $0x40] sm:$0xff] %v3221_v14  ;;  %3237 = vst [vmem:[%s4062_s13 + $0x50] sm:$0xff] %v3223_v21  ;;  %v3204_v13 = vmax.f32 %v3116_v27, 0.0  ;;  %v3205_v30 = vmax.f32 %v3191_v15, 0.0  ;;  %v3119_v56 = vpop.f32.mrb[18].mxu0 }
 0x3d5   : > { %v3217_v4 = vadd.f32 %v3510_v60, %v3203_v16  ;;  %v3226_v2 = vadd.f32 %v3212_v9, %v3653_v23  ;;  %v3120_v18 = vadd.f32 %v3119_v56, %v2885_v43  ;;  %v3121_v19 = vpop.f32.mrb[19].mxu0  ;;  %v3513_v23 = vld [vmem:[%s3614_s24 + $0x60] sm:$0xff] }
 0x3d6   : > { %v3218_v24 = vadd.f32 %v3511_v47, %v3204_v13  ;;  %v3219_v26 = vadd.f32 %v3205_v30, %v3650_v22  ;;  %v3122_v20 = vadd.f32 %v3121_v19, %v2885_v43 }
 0x3d7   : > { %3231 = vst [vmem:[%s4062_s13 + $0x20] sm:$0xff] %v3217_v4  ;;  %3240 = vst.msk [vmem:[%s4062_s13 + $0x68] sm:$0xff] %vm422_vm0, %v3226_v2  ;;  %v3210_v31 = vmax.f32 %v3120_v18, 0.0 }
 0x3d8   : > { %3232 = vst [vmem:[%s4062_s13 + $0x28] sm:$0xff] %v3218_v24  ;;  %3233 = vst.msk [vmem:[%s4062_s13 + $0x30] sm:$0xff] %vm422_vm0, %v3219_v26  ;;  %v3211_v29 = vmax.f32 %v3122_v20, 0.0 }
 0x3d9   : > { %v3224_v62 = vadd.f32 %v3512_v46, %v3210_v31 }
 0x3da   : > { %v3225_v1 = vadd.f32 %v3513_v23, %v3211_v29 }
 0x3db   : > { %3238 = vst [vmem:[%s4062_s13 + $0x58] sm:$0xff] %v3224_v62 }
 0x3dc   : > { %3239 = vst [vmem:[%s4062_s13 + $0x60] sm:$0xff] %v3225_v1 }
 0x3dd PF: > { %s21_s17 = sadd.s32 1, %s3520_s17  }
 0x3de   : > { %p18_p4 = scmp.ge.s32.totalorder %s21_s17, 4  }
 0x3e0   :  { %20 = sbr.rel (!%p18_p4) target bundleno = 1 (0x1), region = 102 }

</bundles_post_ra>
